<compile_context>
chip_gen: v6e
topology: v6e:2x2x1
jax: 0.10.0
libtpu: 0.0.40
codegen_flags: <defaults>
</compile_context>

<pallas_src>
import functools

import jax
import jax.numpy as jnp
import numpy as np
from jax import lax
from jax.experimental import pallas as pl
from jax.experimental.pallas import tpu as pltpu

_EPS_BN = 1e-5  # PyTorch BatchNorm1d default eps


# ------------------------------------------------------------- sizing utils ---

@functools.lru_cache(maxsize=None)
def _vmem_budget_bytes():
    """Generation-aware scoped-VMEM budget (~half of physical per-core VMEM)."""
    cap = 0
    try:
        cap = int(getattr(pltpu.get_tpu_info(), "vmem_capacity_bytes", 0) or 0)
    except Exception:
        cap = 0
    if cap <= 0:
        cap = 64 * 1024 * 1024          # conservative fallback (v7x-sized)
    return int(min(max(cap // 2, 16 * 1024 * 1024), 96 * 1024 * 1024))


def _cdiv(a, b):
    return -(-a // b)


def _pack_factor(n, d):
    """Lane-dense packing factor k: view (N, D) as (N/k, k*D) with k*D == 128."""
    if d >= 128 or d <= 0 or 128 % d != 0:
        return 1
    k = 128 // d
    if n % k != 0:
        # TODO(synk): split off the remainder rows instead of falling back.
        return 1
    return k


def _tile_rows(n_rows, d_eff, tm_cap=None):
    """Row-tile size from a per-pipeline-buffer byte budget (no hard row cap)."""
    per_buf = min(4 << 20, _vmem_budget_bytes() // 8)   # ~4 MiB per buffer
    rows = max(8, (per_buf // (4 * max(d_eff, 1))) // 8 * 8)
    if tm_cap is not None:
        rows = max(8, min(rows, (tm_cap // 8) * 8))
    return n_rows if n_rows <= rows else rows


def _use_fused(n_rows, d_eff):
    """Fused single-call path when the whole (packed) x fits easily in VMEM."""
    return n_rows * d_eff * 4 <= _vmem_budget_bytes() // 8


# ------------------------------------------------------------------ kernels ---

def _stats_kernel(x_ref, sum_ref, sumsq_ref, *, tm, spc, n_valid, static_full):
    """Accumulate per-column sum and sum-of-squares over row tiles.

    Grid is (n_split, tiles_per_split); each split chunk owns its own (8, De)
    partial-accumulator block (row 0 carries the totals)."""
    i = pl.program_id(1)

    @pl.when(i == 0)
    def _():
        sum_ref[...] = jnp.zeros_like(sum_ref)
        sumsq_ref[...] = jnp.zeros_like(sumsq_ref)

    x = x_ref[...].astype(jnp.float32)                              # (tm, De)

    def _acc(xv):
        sum_ref[...] += jnp.sum(xv, axis=0, keepdims=True)
        sumsq_ref[...] += jnp.sum(xv * xv, axis=0, keepdims=True)

    if static_full:
        _acc(x)                                                     # no masking needed
    else:
        c = pl.program_id(0)
        block_start = (c * spc + i) * tm
        needs_mask = block_start + tm > n_valid

        @pl.when(needs_mask)                                        # edge / phantom tile
        def _():
            row = lax.broadcasted_iota(jnp.int32, (tm, 1), 0) + block_start
            _acc(jnp.where(row < n_valid, x, 0.0))

        @pl.when(jnp.logical_not(needs_mask))                       # hot path, unmasked
        def _():
            _acc(x)


def _affine_kernel(x_ref, a_ref, b_ref, o_ref):
    """out = x * a + b   (BN / pair-norm / group1 all fold into this)."""
    x = x_ref[...].astype(jnp.float32)
    o_ref[...] = (x * a_ref[...] + b_ref[...]).astype(o_ref.dtype)


def _fused_norm_kernel(x_ref, g_ref, b_ref, o_ref, *, n_rows, k, d, mode,
                       skip_weight):
    """Small-N fused path: stats + normalization in one pass, x fully resident.

    x is the lane-packed (Np, k*D) view; the k packed copies are folded with
    log2(k) lane rotations so every lane holds its feature's full-batch stat."""
    x = x_ref[...].astype(jnp.float32)                              # (Np, De)
    s = jnp.sum(x, axis=0, keepdims=True)                           # (1, De)
    ss = jnp.sum(x * x, axis=0, keepdims=True)

    st, sst = s, ss
    shift = d
    while shift < k * d:                                            # lane fold (XLU)
        st = st + pltpu.roll(st, shift, axis=1)
        sst = sst + pltpu.roll(sst, shift, axis=1)
        shift *= 2

    inv_n = 1.0 / float(n_rows)
    mean = st * inv_n                                               # per-feature, tiled

    if mode == "pair":
        tot = jnp.sum(ss, keepdims=True)                            # sum x^2 (all)
        msq = jnp.sum(mean * mean, keepdims=True)                   # k * sum_d mean^2
        tot = jnp.maximum(tot - float(n_rows) * msq * (1.0 / k), 0.0)
        scale = lax.rsqrt(1e-6 + tot * inv_n)                       # (1, 1)
        o_ref[...] = ((x - mean) * scale).astype(o_ref.dtype)
    else:
        var = jnp.maximum(sst * inv_n - mean * mean, 0.0)
        inv = lax.rsqrt(var + _EPS_BN)
        a = inv * g_ref[...]
        b = b_ref[...] - mean * a
        if mode == "group1":
            o_ref[...] = (x * (1.0 + skip_weight * a)
                          + skip_weight * b).astype(o_ref.dtype)
        else:  # "batch"
            o_ref[...] = (x * a + b).astype(o_ref.dtype)


def _group_stats_kernel(x_ref, w_ref, bias_ref, sum_ref, sumsq_ref, *,
                        tm, n_valid, static_full):
    """Per-group weighted sums via MXU: S += score^T@x, SS += (score^2)^T@(x^2)."""
    i = pl.program_id(0)

    @pl.when(i == 0)
    def _():
        sum_ref[...] = jnp.zeros_like(sum_ref)
        sumsq_ref[...] = jnp.zeros_like(sumsq_ref)

    x = x_ref[...].astype(jnp.float32)                              # (tm, D)

    def _softmax(xv):
        logits = jnp.dot(xv, w_ref[...],
                         preferred_element_type=jnp.float32) + bias_ref[...]
        logits = logits - jnp.max(logits, axis=1, keepdims=True)
        e = jnp.exp(logits)
        return e * pl.reciprocal(jnp.sum(e, axis=1, keepdims=True), approx=True)

    def _acc(xv, score):
        contract = (((0,), (0,)), ((), ()))                         # -> (G, D)
        sum_ref[...] += lax.dot_general(score, xv, contract,
                                        preferred_element_type=jnp.float32)
        sumsq_ref[...] += lax.dot_general(score * score, xv * xv, contract,
                                          preferred_element_type=jnp.float32)

    if static_full:
        _acc(x, _softmax(x))
    else:
        block_start = i * tm
        needs_mask = block_start + tm > n_valid

        @pl.when(needs_mask)
        def _():
            row = lax.broadcasted_iota(jnp.int32, (tm, 1), 0) + block_start
            valid = row < n_valid
            xm = jnp.where(valid, x, 0.0)
            _acc(xm, jnp.where(valid, _softmax(xm), 0.0))

        @pl.when(jnp.logical_not(needs_mask))
        def _():
            _acc(x, _softmax(x))


def _group_apply_kernel(x_ref, w_ref, bias_ref, a_ref, b_ref, o_ref):
    """out = x * (1 + score @ A') + B'  with A' = sw*inv*gamma (G,D),
       B' = sw*sum_g(beta_g - mean_g*inv_g*gamma_g) (1,D)."""
    x = x_ref[...].astype(jnp.float32)
    logits = jnp.dot(x, w_ref[...],
                     preferred_element_type=jnp.float32) + bias_ref[...]
    logits = logits - jnp.max(logits, axis=1, keepdims=True)
    e = jnp.exp(logits)
    score = e * pl.reciprocal(jnp.sum(e, axis=1, keepdims=True), approx=True)
    gate = jnp.dot(score, a_ref[...], preferred_element_type=jnp.float32)
    o_ref[...] = (x * (1.0 + gate) + b_ref[...]).astype(o_ref.dtype)


# ------------------------------------------------------------ pallas_call's ---

def _compute_stats(x, tm):
    """Streaming sum / sum-of-squares with a 2-chunk 'parallel' split (v7x)."""
    Np, De = x.shape
    T = _cdiv(Np, tm)
    n_split = 2 if T >= 2 else 1
    spc = _cdiv(T, n_split)
    t_last = T - 1
    static_full = (Np % tm == 0) and (T % n_split == 0)
    itemsize = x.dtype.itemsize
    kern = functools.partial(_stats_kernel, tm=tm, spc=spc, n_valid=Np,
                             static_full=static_full)
    return pl.pallas_call(
        kern,
        out_shape=(jax.ShapeDtypeStruct((8 * n_split, De), jnp.float32),
                   jax.ShapeDtypeStruct((8 * n_split, De), jnp.float32)),
        grid=(n_split, spc),
        in_specs=[pl.BlockSpec(
            (tm, De),
            # phantom tiles of an uneven split re-read the last tile; their
            # contribution is fully masked inside the kernel.
            lambda c, i: (jnp.minimum(c * spc + i, t_last), 0))],
        out_specs=(pl.BlockSpec((8, De), lambda c, i: (c, 0)),
                   pl.BlockSpec((8, De), lambda c, i: (c, 0))),
        compiler_params=pltpu.CompilerParams(
            dimension_semantics=("parallel", "arbitrary"),
            vmem_limit_bytes=_vmem_budget_bytes()),
        cost_estimate=pl.CostEstimate(
            flops=3 * Np * De, transcendentals=0,
            bytes_accessed=Np * De * itemsize + 2 * 8 * n_split * De * 4),
    )(x)


def _fold_partials(raw, k, d):
    """(8*n_split, k*D) partial accumulators -> (1, D) per-feature totals."""
    per_chunk = raw[0::8, :]                      # row 0 of each 8-row slab
    tot = jnp.sum(per_chunk, axis=0)              # (k*D,)
    return jnp.sum(tot.reshape(k, d), axis=0).reshape(1, d)


def _affine_apply(x, a, b, tm):
    Np, De = x.shape
    itemsize = x.dtype.itemsize
    return pl.pallas_call(
        _affine_kernel,
        out_shape=jax.ShapeDtypeStruct((Np, De), x.dtype),
        grid=(pl.cdiv(Np, tm),),
        in_specs=[pl.BlockSpec((tm, De), lambda i: (i, 0)),
                  pl.BlockSpec((1, De), lambda i: (0, 0)),
                  pl.BlockSpec((1, De), lambda i: (0, 0))],
        out_specs=pl.BlockSpec((tm, De), lambda i: (i, 0)),
        compiler_params=pltpu.CompilerParams(
            dimension_semantics=("parallel",),    # both TCs on v7x
            vmem_limit_bytes=_vmem_budget_bytes()),
        cost_estimate=pl.CostEstimate(
            flops=2 * Np * De, transcendentals=0,
            bytes_accessed=2 * Np * De * itemsize + 2 * De * 4),
    )(x, a, b)


def _fused_call(xp, g, b, *, mode, n_rows, k, d, skip_weight=0.0):
    Np, De = xp.shape
    itemsize = xp.dtype.itemsize
    kern = functools.partial(_fused_norm_kernel, n_rows=n_rows, k=k, d=d,
                             mode=mode, skip_weight=float(skip_weight))
    return pl.pallas_call(
        kern,
        out_shape=jax.ShapeDtypeStruct((Np, De), xp.dtype),
        grid=(1,),
        in_specs=[pl.BlockSpec((Np, De), lambda i: (0, 0)),
                  pl.BlockSpec((1, De), lambda i: (0, 0)),
                  pl.BlockSpec((1, De), lambda i: (0, 0))],
        out_specs=pl.BlockSpec((Np, De), lambda i: (0, 0)),
        compiler_params=pltpu.CompilerParams(
            dimension_semantics=("arbitrary",),
            vmem_limit_bytes=_vmem_budget_bytes()),
        cost_estimate=pl.CostEstimate(
            flops=6 * Np * De, transcendentals=De,
            bytes_accessed=2 * Np * De * itemsize + 2 * De * 4),
    )(xp, g, b)


def _compute_group_stats(x, w, bias, tm):
    N, D = x.shape
    G = w.shape[1]
    itemsize = x.dtype.itemsize
    static_full = (N % tm == 0)
    return pl.pallas_call(
        functools.partial(_group_stats_kernel, tm=tm, n_valid=N,
                          static_full=static_full),
        out_shape=(jax.ShapeDtypeStruct((G, D), jnp.float32),
                   jax.ShapeDtypeStruct((G, D), jnp.float32)),
        grid=(pl.cdiv(N, tm),),
        in_specs=[pl.BlockSpec((tm, D), lambda i: (i, 0)),
                  pl.BlockSpec((D, G), lambda i: (0, 0)),
                  pl.BlockSpec((1, G), lambda i: (0, 0))],
        out_specs=(pl.BlockSpec((G, D), lambda i: (0, 0)),
                   pl.BlockSpec((G, D), lambda i: (0, 0))),
        compiler_params=pltpu.CompilerParams(
            dimension_semantics=("arbitrary",),
            vmem_limit_bytes=_vmem_budget_bytes()),
        cost_estimate=pl.CostEstimate(
            flops=6 * N * D * G + 4 * N * D, transcendentals=N * G,
            bytes_accessed=N * D * itemsize + D * G * 4 + 2 * G * D * 4),
    )(x, w, bias)


def _group_apply(x, w, bias, a, b, tm):
    N, D = x.shape
    G = w.shape[1]
    itemsize = x.dtype.itemsize
    return pl.pallas_call(
        _group_apply_kernel,
        out_shape=jax.ShapeDtypeStruct((N, D), x.dtype),
        grid=(pl.cdiv(N, tm),),
        in_specs=[pl.BlockSpec((tm, D), lambda i: (i, 0)),
                  pl.BlockSpec((D, G), lambda i: (0, 0)),
                  pl.BlockSpec((1, G), lambda i: (0, 0)),
                  pl.BlockSpec((G, D), lambda i: (0, 0)),
                  pl.BlockSpec((1, D), lambda i: (0, 0))],
        out_specs=pl.BlockSpec((tm, D), lambda i: (i, 0)),
        compiler_params=pltpu.CompilerParams(
            dimension_semantics=("parallel",),
            vmem_limit_bytes=_vmem_budget_bytes()),
        cost_estimate=pl.CostEstimate(
            flops=4 * N * D * G + 4 * N * D, transcendentals=N * G,
            bytes_accessed=2 * N * D * itemsize + (D * G + G * D + D + G) * 4),
    )(x, w, bias, a, b)


# ---------------------------------------------------------- jitted forwards ---

@functools.partial(jax.jit, static_argnames=("allow_fused", "tm_cap"))
def _batch_forward(x, gamma, beta, allow_fused=True, tm_cap=None):
    N, D = x.shape
    k = _pack_factor(N, D)
    Np, De = N // k, k * D
    xp = x.reshape(Np, De)                                 # lane-dense view
    gamma = gamma.astype(jnp.float32).reshape(1, D)
    beta = beta.astype(jnp.float32).reshape(1, D)
    if allow_fused and tm_cap is None and _use_fused(Np, De):
        out = _fused_call(xp, jnp.tile(gamma, (1, k)), jnp.tile(beta, (1, k)),
                          mode="batch", n_rows=N, k=k, d=D)
    else:
        tm = _tile_rows(Np, De, tm_cap)
        s_raw, ss_raw = _compute_stats(xp, tm)
        s = _fold_partials(s_raw, k, D)
        ss = _fold_partials(ss_raw, k, D)
        mean = s * (1.0 / N)
        var = jnp.maximum(ss * (1.0 / N) - mean * mean, 0.0)
        inv = lax.rsqrt(var + _EPS_BN)
        a = inv * gamma
        b = beta - mean * a
        out = _affine_apply(xp, jnp.tile(a, (1, k)), jnp.tile(b, (1, k)), tm)
    return out.reshape(N, D)


@functools.partial(jax.jit, static_argnames=("allow_fused", "tm_cap"))
def _pair_forward(x, allow_fused=True, tm_cap=None):
    N, D = x.shape
    k = _pack_factor(N, D)
    Np, De = N // k, k * D
    xp = x.reshape(Np, De)
    if allow_fused and tm_cap is None and _use_fused(Np, De):
        ones = jnp.ones((1, De), jnp.float32)
        zeros = jnp.zeros((1, De), jnp.float32)
        out = _fused_call(xp, ones, zeros, mode="pair", n_rows=N, k=k, d=D)
    else:
        tm = _tile_rows(Np, De, tm_cap)
        s_raw, ss_raw = _compute_stats(xp, tm)
        s = _fold_partials(s_raw, k, D)
        ss = _fold_partials(ss_raw, k, D)
        mean = s * (1.0 / N)
        tot = jnp.maximum(jnp.sum(ss - N * mean * mean), 0.0)
        scale = lax.rsqrt(1e-6 + tot * (1.0 / N))
        a = jnp.full((1, D), 1.0, jnp.float32) * scale
        b = -mean * scale
        out = _affine_apply(xp, jnp.tile(a, (1, k)), jnp.tile(b, (1, k)), tm)
    return out.reshape(N, D)


@functools.partial(jax.jit,
                   static_argnames=("skip_weight", "allow_fused", "tm_cap"))
def _group1_forward(x, gamma, beta, skip_weight=0.005, allow_fused=True,
                    tm_cap=None):
    # num_groups == 1 branch: out = x + bn(x)*sw == x*(1 + sw*a) + sw*b
    N, D = x.shape
    k = _pack_factor(N, D)
    Np, De = N // k, k * D
    xp = x.reshape(Np, De)
    gamma = gamma.astype(jnp.float32).reshape(1, D)
    beta = beta.astype(jnp.float32).reshape(1, D)
    if allow_fused and tm_cap is None and _use_fused(Np, De):
        out = _fused_call(xp, jnp.tile(gamma, (1, k)), jnp.tile(beta, (1, k)),
                          mode="group1", n_rows=N, k=k, d=D,
                          skip_weight=skip_weight)
    else:
        tm = _tile_rows(Np, De, tm_cap)
        s_raw, ss_raw = _compute_stats(xp, tm)
        s = _fold_partials(s_raw, k, D)
        ss = _fold_partials(ss_raw, k, D)
        mean = s * (1.0 / N)
        var = jnp.maximum(ss * (1.0 / N) - mean * mean, 0.0)
        inv = lax.rsqrt(var + _EPS_BN)
        a = inv * gamma
        b = beta - mean * a
        out = _affine_apply(xp,
                            jnp.tile(1.0 + skip_weight * a, (1, k)),
                            jnp.tile(skip_weight * b, (1, k)), tm)
    return out.reshape(N, D)


@functools.partial(jax.jit, static_argnames=("skip_weight", "tm_cap"))
def _group_forward(x, w, bias, gamma, beta, skip_weight=0.005, tm_cap=None):
    # TODO(synk): lane-dense packing / two-core stats split for the group branch.
    N, D = x.shape
    tm = _tile_rows(N, D, tm_cap)
    s, ss = _compute_group_stats(x, w, bias, tm)           # (G, D) each
    mean = s * (1.0 / N)
    var = jnp.maximum(ss * (1.0 / N) - mean * mean, 0.0)
    inv = lax.rsqrt(var + _EPS_BN)
    a_g = inv * gamma                                      # (G, D)
    b_sum = jnp.sum(beta - mean * a_g, axis=0, keepdims=True)   # (1, D)
    return _group_apply(x, w, bias, skip_weight * a_g, skip_weight * b_sum, tm)


# ------------------------------------------------------------------ wrapper ---

class BatchNormPallas:
    def __init__(self, dim_hidden, type_norm, skip_connect=False, num_groups=1,
                 skip_weight=0.005, key=None):
        self.type_norm = type_norm
        self.skip_connect = skip_connect
        self.num_groups = num_groups
        self.skip_weight = float(skip_weight)
        self.dim_hidden = dim_hidden
        if type_norm == 'batch':
            # BatchNorm1d(dim_hidden): gamma=1, beta=0 (PyTorch default init)
            self.gamma = jnp.ones((1, dim_hidden), jnp.float32)
            self.beta = jnp.zeros((1, dim_hidden), jnp.float32)
        elif type_norm == 'group':
            # BatchNorm1d(dim_hidden * num_groups), viewed as (G, D)
            self.gamma = jnp.ones((num_groups, dim_hidden), jnp.float32)
            self.beta = jnp.zeros((num_groups, dim_hidden), jnp.float32)
            if num_groups > 1:
                if key is None:
                    key = jax.random.PRNGKey(42)
                k1, k2 = jax.random.split(key)
                bound = 1.0 / float(dim_hidden) ** 0.5
                # Linear(dim_hidden, num_groups): W stored as (D, G) == torch W.T
                self.w = jax.random.uniform(k1, (dim_hidden, num_groups),
                                            jnp.float32, -bound, bound)
                self.b = jax.random.uniform(k2, (1, num_groups),
                                            jnp.float32, -bound, bound)

    def __call__(self, x):
        if self.type_norm == 'None':
            return x
        if self.type_norm == 'batch':
            return _batch_forward(x, self.gamma, self.beta)
        if self.type_norm == 'pair':
            return _pair_forward(x)
        if self.type_norm == 'group':
            if self.num_groups == 1:
                return _group1_forward(x, self.gamma, self.beta,
                                       skip_weight=self.skip_weight)
            return _group_forward(x, self.w, self.b, self.gamma, self.beta,
                                  skip_weight=self.skip_weight)
        raise Exception('the normalization has not been implemented')


# --------------------------------------------------------------- references ---

def _ref_bn(x, eps=_EPS_BN):
    mean = x.mean(0)
    var = ((x - mean) ** 2).mean(0)
    return (x - mean) / jnp.sqrt(var + eps)


def _ref_pair(x):
    xc = x - x.mean(0)
    return xc / jnp.sqrt(1e-6 + (xc ** 2).sum(1).mean())


def _ref_group(x, w, b, num_groups, dim_hidden, skip_weight):
    score = jax.nn.softmax(x @ w + b, axis=1)
    xt = jnp.concatenate([score[:, g:g + 1] * x for g in range(num_groups)],
                         axis=1)                           # (N, G*D)
    xt = _ref_bn(xt)
    xt = xt.reshape(-1, num_groups, dim_hidden).sum(1)
    return x + xt * skip_weight


# --------------------------------------------------------------------- main ---

if __name__ == "__main__":
    key = jax.random.PRNGKey(0)
    kx, kx2, kx3, kp = jax.random.split(key, 4)

    N, D, G = 64, 32, 4
    x = jax.random.normal(kx, (N, D), jnp.float32)

    mods = {
        'None':   BatchNormPallas(D, 'None'),
        'batch':  BatchNormPallas(D, 'batch'),
        'pair':   BatchNormPallas(D, 'pair'),
        'group':  BatchNormPallas(D, 'group', num_groups=G, key=kp),
        'group1': BatchNormPallas(D, 'group', num_groups=1),
    }

    outs = {name: jax.block_until_ready(m(x)) for name, m in mods.items()}

    # correctness checks against pure-JAX references (fused, lane-packed path)
    np.testing.assert_allclose(np.asarray(outs['None']), np.asarray(x),
                               rtol=1e-5, atol=1e-5)
    np.testing.assert_allclose(np.asarray(outs['batch']),
                               np.asarray(_ref_bn(x)), rtol=1e-4, atol=1e-4)
    np.testing.assert_allclose(np.asarray(outs['pair']),
                               np.asarray(_ref_pair(x)), rtol=1e-4, atol=1e-4)
    mg = mods['group']
    np.testing.assert_allclose(
        np.asarray(outs['group']),
        np.asarray(_ref_group(x, mg.w, mg.b, G, D, mg.skip_weight)),
        rtol=1e-4, atol=1e-4)
    np.testing.assert_allclose(
        np.asarray(outs['group1']),
        np.asarray(x + _ref_bn(x) * mods['group1'].skip_weight),
        rtol=1e-4, atol=1e-4)

    # larger input, default dispatch (packed fused path, Np=150 / De=128)
    N2 = 600
    x2 = jax.random.normal(kx2, (N2, D), jnp.float32)
    out_b2 = jax.block_until_ready(mods['batch'](x2))
    np.testing.assert_allclose(np.asarray(out_b2), np.asarray(_ref_bn(x2)),
                               rtol=1e-4, atol=1e-4)
    out_g2 = jax.block_until_ready(mods['group'](x2))
    np.testing.assert_allclose(
        np.asarray(out_g2),
        np.asarray(_ref_group(x2, mg.w, mg.b, G, D, mg.skip_weight)),
        rtol=1e-4, atol=1e-4)

    # streaming two-pass path: multi-tile grid, 2-chunk parallel stats split,
    # clamped phantom tile and masked partial edge tile
    gb = mods['batch']
    out_b2s = jax.block_until_ready(
        _batch_forward(x2, gb.gamma, gb.beta, allow_fused=False, tm_cap=64))
    np.testing.assert_allclose(np.asarray(out_b2s), np.asarray(_ref_bn(x2)),
                               rtol=1e-4, atol=1e-4)
    out_p2s = jax.block_until_ready(
        _pair_forward(x2, allow_fused=False, tm_cap=64))
    np.testing.assert_allclose(np.asarray(out_p2s), np.asarray(_ref_pair(x2)),
                               rtol=1e-4, atol=1e-4)
    out_g2s = jax.block_until_ready(
        _group_forward(x2, mg.w, mg.b, mg.gamma, mg.beta,
                       skip_weight=mg.skip_weight, tm_cap=64))
    np.testing.assert_allclose(
        np.asarray(out_g2s),
        np.asarray(_ref_group(x2, mg.w, mg.b, G, D, mg.skip_weight)),
        rtol=1e-4, atol=1e-4)

    # unpacked fallback (N not divisible by the packing factor)
    N3 = 97
    x3 = jax.random.normal(kx3, (N3, D), jnp.float32)
    out_b3 = jax.block_until_ready(mods['batch'](x3))
    np.testing.assert_allclose(np.asarray(out_b3), np.asarray(_ref_bn(x3)),
                               rtol=1e-4, atol=1e-4)

    print("KERNEL_OK")
</pallas_src>

<mosaic_0001>
module attributes {stable_mosaic.version = 11 : i64} {
  func.func @_fused_norm_kernel(%arg0: i32, %arg1: memref<16x128xf32, #tpu.memory_space<vmem>>, %arg2: memref<1x128xf32, #tpu.memory_space<vmem>>, %arg3: memref<1x128xf32, #tpu.memory_space<vmem>>, %arg4: memref<16x128xf32, #tpu.memory_space<vmem>>) attributes {dimension_semantics = [#tpu.dimension_semantics<arbitrary>], iteration_bounds = array<i64: 1>, scalar_prefetch = 0 : i64, scratch_operands = 0 : i64, tpu.core_type = #tpu.core_type<tc>, window_params = [{pipeline_mode = #tpu.pipeline_mode<synchronous>, transform_indices = @transform_0, window_bounds = array<i64: 16, 128>}, {pipeline_mode = #tpu.pipeline_mode<synchronous>, transform_indices = @transform_1, window_bounds = array<i64: 1, 128>}, {pipeline_mode = #tpu.pipeline_mode<synchronous>, transform_indices = @transform_2, window_bounds = array<i64: 1, 128>}, {pipeline_mode = #tpu.pipeline_mode<synchronous>, transform_indices = @transform_3, window_bounds = array<i64: 16, 128>}]} {
    %c0 = arith.constant 0 : index
    %c0_0 = arith.constant 0 : index
    %0 = vector.load %arg1[%c0, %c0_0] : memref<16x128xf32, #tpu.memory_space<vmem>>, vector<16x128xf32>
    %cst = arith.constant dense<0.000000e+00> : vector<128xf32>
    %1 = vector.multi_reduction <add>, %0, %cst [0] : vector<16x128xf32> to vector<128xf32>
    %2 = vector.shape_cast %1 : vector<128xf32> to vector<1x128xf32>
    %3 = arith.mulf %0, %0 : vector<16x128xf32>
    %cst_1 = arith.constant dense<0.000000e+00> : vector<128xf32>
    %4 = vector.multi_reduction <add>, %3, %cst_1 [0] : vector<16x128xf32> to vector<128xf32>
    %5 = vector.shape_cast %4 : vector<128xf32> to vector<1x128xf32>
    %c32_i32 = arith.constant 32 : i32
    %6 = tpu.dynamic_rotate %2 by %c32_i32 dim 1 : vector<1x128xf32>, i32 -> vector<1x128xf32>
    %7 = arith.addf %2, %6 : vector<1x128xf32>
    %c32_i32_2 = arith.constant 32 : i32
    %8 = tpu.dynamic_rotate %5 by %c32_i32_2 dim 1 : vector<1x128xf32>, i32 -> vector<1x128xf32>
    %9 = arith.addf %5, %8 : vector<1x128xf32>
    %c64_i32 = arith.constant 64 : i32
    %10 = tpu.dynamic_rotate %7 by %c64_i32 dim 1 : vector<1x128xf32>, i32 -> vector<1x128xf32>
    %11 = arith.addf %7, %10 : vector<1x128xf32>
    %c64_i32_3 = arith.constant 64 : i32
    %12 = tpu.dynamic_rotate %9 by %c64_i32_3 dim 1 : vector<1x128xf32>, i32 -> vector<1x128xf32>
    %13 = arith.addf %9, %12 : vector<1x128xf32>
    %cst_4 = arith.constant 1.562500e-02 : f32
    %14 = vector.broadcast %cst_4 : f32 to vector<1x128xf32>
    %15 = arith.mulf %11, %14 : vector<1x128xf32>
    %cst_5 = arith.constant 1.562500e-02 : f32
    %16 = vector.broadcast %cst_5 : f32 to vector<1x128xf32>
    %17 = arith.mulf %13, %16 : vector<1x128xf32>
    %18 = arith.mulf %15, %15 : vector<1x128xf32>
    %19 = arith.subf %17, %18 : vector<1x128xf32>
    %cst_6 = arith.constant 0.000000e+00 : f32
    %20 = vector.broadcast %cst_6 : f32 to vector<1x128xf32>
    %21 = arith.maximumf %19, %20 : vector<1x128xf32>
    %cst_7 = arith.constant 9.99999974E-6 : f32
    %22 = vector.broadcast %cst_7 : f32 to vector<1x128xf32>
    %23 = arith.addf %21, %22 : vector<1x128xf32>
    %24 = math.rsqrt %23 : vector<1x128xf32>
    %c0_8 = arith.constant 0 : index
    %c0_9 = arith.constant 0 : index
    %25 = vector.load %arg2[%c0_8, %c0_9] : memref<1x128xf32, #tpu.memory_space<vmem>>, vector<1x128xf32>
    %26 = arith.mulf %24, %25 : vector<1x128xf32>
    %c0_10 = arith.constant 0 : index
    %c0_11 = arith.constant 0 : index
    %27 = vector.load %arg3[%c0_10, %c0_11] : memref<1x128xf32, #tpu.memory_space<vmem>>, vector<1x128xf32>
    %28 = arith.mulf %15, %26 : vector<1x128xf32>
    %29 = arith.subf %27, %28 : vector<1x128xf32>
    %30 = vector.broadcast %26 : vector<1x128xf32> to vector<16x128xf32>
    %31 = arith.mulf %0, %30 : vector<16x128xf32>
    %32 = vector.broadcast %29 : vector<1x128xf32> to vector<16x128xf32>
    %33 = arith.addf %31, %32 : vector<16x128xf32>
    %c0_12 = arith.constant 0 : index
    %c0_13 = arith.constant 0 : index
    %34 = vector.load %arg4[%c0_12, %c0_13] : memref<16x128xf32, #tpu.memory_space<vmem>>, vector<16x128xf32>
    tpu.vector_store %arg4[%c0_12, %c0_13], %33 {strides = array<i32>} : memref<16x128xf32, #tpu.memory_space<vmem>>, vector<16x128xf32>,
    return
  }
  func.func @transform_0(%arg0: i32) -> (i32, i32) {
    %c0_i32 = arith.constant 0 : i32
    %c0_i32_0 = arith.constant 0 : i32
    %c0_i32_1 = arith.constant 0 : i32
    return %c0_i32, %c0_i32_0 : i32, i32
  }
  func.func @transform_1(%arg0: i32) -> (i32, i32) {
    %c0_i32 = arith.constant 0 : i32
    %c0_i32_0 = arith.constant 0 : i32
    %c0_i32_1 = arith.constant 0 : i32
    return %c0_i32, %c0_i32_0 : i32, i32
  }
  func.func @transform_2(%arg0: i32) -> (i32, i32) {
    %c0_i32 = arith.constant 0 : i32
    %c0_i32_0 = arith.constant 0 : i32
    %c0_i32_1 = arith.constant 0 : i32
    return %c0_i32, %c0_i32_0 : i32, i32
  }
  func.func @transform_3(%arg0: i32) -> (i32, i32) {
    %c0_i32 = arith.constant 0 : i32
    %c0_i32_0 = arith.constant 0 : i32
    %c0_i32_1 = arith.constant 0 : i32
    return %c0_i32, %c0_i32_0 : i32, i32
  }
}

</mosaic_0001>

<bundles_post_ra>
// kernel: _batch_forward.1
= control target key start
LH: loop header
LB: loop body
LE: loop exit
PB: predicated region body
PF: predicated region fallthrough
CT: control target
= control target key end

     0   :  { %s80_s16 = smov 32   ;;  %v56_v32 = vlaneseq  ;;  %s120_s0 = inlined_call_operand.vmem [shape: f32[16,128], index: 0, kind: input, shape index: {}]   ;;  %s121_s1 = inlined_call_operand.vmem [shape: f32[1,128], index: 1, kind: input, shape index: {}]   ;;  %s122_s2 = inlined_call_operand.vmem [shape: f32[1,128], index: 2, kind: input, shape index: {}]   ;;  %s123_s3 = inlined_call_operand.vmem [shape: f32[16,128], index: 3, kind: output, shape index: {}]  }
   0x1   :  { %v14_v0 = vld [vmem:[%s120_s0] sm:$0xff]  ;;  %v15_v1 = vld [vmem:[%s120_s0 + $0x8] sm:$0xff]  ;;  %s81_s0 = smov 64  }
   0x2   :  { %v16_v2 = vadd.f32 %v15_v1, %v14_v0  ;;  %v23_v3 = vmul.f32 %v14_v0, %v14_v0  ;;  %v24_v4 = vmul.f32 %v15_v1, %v15_v1  ;;  %v57_v33 = vshrl.u32 %v56_v32, 7  ;;  %v51_v34 = vld [vmem:[%s121_s1] sm:$0x1] }
   0x3   :  { %v53_v38 = vld [vmem:[%s122_s2] sm:$0x1] }
   0x4   :  { %v17_v5 = vrot.slane %v16_v2, 4  ;;  %v25_v6 = vadd.f32 %v24_v4, %v23_v3  ;;  %v58_v35 = vsub.s32 0, %v57_v33 }
   0x6   :  { %v18_v7 = vadd.f32 %v17_v5, %v16_v2  ;;  %v26_v8 = vrot.slane %v25_v6, 4 }
   0x8   :  { %v19_v9 = vrot.slane %v18_v7, 2  ;;  %v27_v10 = vadd.f32 %v26_v8, %v25_v6 }
   0xa   :  { %v20_v11 = vadd.f32 %v19_v9, %v18_v7  ;;  %v28_v12 = vrot.slane %v27_v10, 2 }
   0xc   :  { %v21_v13 = vrot.slane %v20_v11, 1  ;;  %v29_v14 = vadd.f32 %v28_v12, %v27_v10 }
   0xe   :  { %v22_v15 = vadd.f32 %v21_v13, %v20_v11  ;;  %v30_v16 = vrot.slane %v29_v14, 1 }
  0x10   :  { %32 = vrot.lane.b32.xlu0 %v22_v15, %s80_s16  ;;  %v31_v17 = vadd.f32 %v30_v16, %v29_v14 }
  0x14   :  { %35 = vrot.lane.b32.xlu0 %v31_v17, %s80_s16 }
  0x82   :  { %v33_v18 = vpop.permute.xlu0 %32 }
  0x83   :  { %v34_v19 = vadd.f32 %v33_v18, %v22_v15 }
  0x85   :  { %38 = vrot.lane.b32.xlu1 %v34_v19, %s81_s0 }
  0x86   :  { %v36_v20 = vpop.permute.xlu0 %35 }
  0x87   :  { %v37_v21 = vadd.f32 %v36_v20, %v31_v17 }
  0x89   :  { %41 = vrot.lane.b32.xlu1 %v37_v21, %s81_s0 }
  0xf7   :  { %v39_v22 = vpop.permute.xlu1 %38 }
  0xf8   :  { %v40_v23 = vadd.f32 %v39_v22, %v34_v19 }
  0xfa   :  { %v44_v24 = vmul.f32 0.015625, %v40_v23 }
  0xfb   :  { %v42_v25 = vpop.permute.xlu1 %41 }
  0xfc   :  { %v43_v26 = vadd.f32 %v42_v25, %v37_v21  ;;  %v46_v27 = vmul.f32 %v44_v24, %v44_v24 }
  0xfe   :  { %v45_v28 = vmul.f32 0.015625, %v43_v26 }
 0x100   :  { %v47_v29 = vsub.f32 %v45_v28, %v46_v27 }
 0x102   :  { %v48_v30 = vmax.f32 %v47_v29, 0.0 }
 0x104   :  { %v49_v31 = vadd.f32 1e-05, %v48_v30 }
 0x106   :  { %78 = vrsqrt.f32 %v49_v31 }
 0x113   :  { %v79_v36 = vpop.eup %78 }
 0x114   :  { %v52_v37 = vmul.f32 %v79_v36, %v51_v34 }
 0x116   :  { %v54_v39 = vmul.f32 %v52_v37, %v44_v24  ;;  %v59_v40 = vrot.slane %v52_v37, %v58_v35 }
 0x118   :  { %v55_v41 = vsub.f32 %v53_v38, %v54_v39  ;;  %v60_v42 = vmul.f32 %v59_v40, %v14_v0  ;;  %v61_v43 = vmul.f32 %v59_v40, %v15_v1 }
 0x11a   :  { %v66_v44 = vrot.slane %v55_v41, %v58_v35 }
 0x11c   :  { %v68_v45 = vadd.f32 %v66_v44, %v60_v42  ;;  %v69_v46 = vadd.f32 %v66_v44, %v61_v43 }
 0x11e   :  { %70 = vst [vmem:[%s123_s3] sm:$0xff] %v68_v45  ;;  %71 = vst [vmem:[%s123_s3 + $0x8] sm:$0xff] %v69_v46 }

</bundles_post_ra>
